<compile_context>
chip_gen: v5e
topology: v5e:2x2
jax: 0.10.0
libtpu: 0.0.40
codegen_flags: <defaults>
</compile_context>

<pallas_src>
import math

import jax
import jax.numpy as jnp
import numpy as np
from jax.experimental import pallas as pl
from jax.experimental.pallas import tpu as pltpu


def _round_up(n, m):
    return ((n + m - 1) // m) * m


def _idft_matmul_kernel(basis_ref, coef_ref, out_ref):
    # basis_ref: (Tp, 2*Fp)  shared across batch
    # coef_ref : (1, 2*Fp, Dp)  dense (masked) coefficients for this batch elem
    # out_ref  : (1, Tp, Dp)
    out_ref[0] = jnp.dot(basis_ref[...], coef_ref[0],
                         preferred_element_type=jnp.float32)


def _prepare_dense_coefficients(x, low_freq=1, factor=1):
    """Plain-JAX glue: rfft, frequency slicing, per-(b,d) top-k mask.

    Returns dense real/imag coefficient tensors (b, F, d) that are zero for
    non-selected frequency bins and 2*Re(z) / 2*Im(z) for selected bins
    (the factor 2 absorbs the conjugate concatenation of the reference), plus
    the candidate frequencies f (F,) and the sequence length t.
    """
    b, t, d = x.shape
    x_freq = jnp.fft.rfft(x, axis=1)                       # (b, t//2+1, d) complex
    if t % 2 == 0:
        x_freq = x_freq[:, low_freq:-1]
        f = jnp.fft.rfftfreq(t)[low_freq:-1]
    else:
        x_freq = x_freq[:, low_freq:]
        f = jnp.fft.rfftfreq(t)[low_freq:]
    F = x_freq.shape[1]
    top_k = max(1, int(factor * math.log(F)))              # clamp: avoid k == 0
    top_k = min(top_k, F)

    # top-k over |x_freq| along the frequency axis, independently per (b, d)
    mag_t = jnp.transpose(jnp.abs(x_freq), (0, 2, 1))      # (b, d, F)
    _, idx = jax.lax.top_k(mag_t, top_k)                   # (b, d, k)
    # dense selection mask instead of gather-then-scatter
    mask = jnp.any(idx[..., None] == jnp.arange(F)[None, None, None, :],
                   axis=2)                                 # (b, d, F) bool

    xf_t = jnp.transpose(x_freq, (0, 2, 1))                # (b, d, F) complex
    cr_t = jnp.where(mask, 2.0 * jnp.real(xf_t), 0.0).astype(jnp.float32)
    ci_t = jnp.where(mask, 2.0 * jnp.imag(xf_t), 0.0).astype(jnp.float32)
    cr = jnp.transpose(cr_t, (0, 2, 1))                    # (b, F, d)
    ci = jnp.transpose(ci_t, (0, 2, 1))                    # (b, F, d)
    return cr, ci, f.astype(jnp.float32), t


def fourier_layer_forward(x, low_freq=1, factor=1):
    """Pallas-accelerated FourierLayer.forward.  x: (b, t, d) float32 -> (b, t, d)."""
    cr, ci, f, t = _prepare_dense_coefficients(x, low_freq, factor)
    b, F, d = cr.shape

    # Padded sizes: lane-dense output (Dp % 128 == 0), lane-dense basis /
    # sublane-aligned K (2*Fp % 128 == 0), sublane-aligned time (Tp % 8 == 0).
    Fp = _round_up(F, 64)
    Dp = _round_up(d, 128)
    Tp = _round_up(t, 8)

    # Stacked coefficients [2*Re ; 2*Im] along the (padded) frequency axis.
    coef = jnp.zeros((b, 2 * Fp, Dp), jnp.float32)
    coef = coef.at[:, :F, :d].set(cr)
    coef = coef.at[:, Fp:Fp + F, :d].set(ci)

    # Shared inverse-DFT basis [cos(2*pi*f*t) | -sin(2*pi*f*t)], computed once.
    tt = jnp.arange(Tp, dtype=jnp.float32)
    theta = (2.0 * math.pi) * tt[:, None] * f[None, :]     # (Tp, F)
    basis = jnp.zeros((Tp, 2 * Fp), jnp.float32)
    basis = basis.at[:, :F].set(jnp.cos(theta))
    basis = basis.at[:, Fp:Fp + F].set(-jnp.sin(theta))

    flops = 2 * b * Tp * (2 * Fp) * Dp
    bytes_accessed = 4 * (b * basis.size + coef.size + b * Tp * Dp)

    out = pl.pallas_call(
        _idft_matmul_kernel,
        out_shape=jax.ShapeDtypeStruct((b, Tp, Dp), jnp.float32),
        grid=(b,),
        in_specs=[
            pl.BlockSpec((Tp, 2 * Fp), lambda i: (0, 0)),        # shared basis
            pl.BlockSpec((1, 2 * Fp, Dp), lambda i: (i, 0, 0)),  # per-batch coeffs
        ],
        out_specs=pl.BlockSpec((1, Tp, Dp), lambda i: (i, 0, 0)),
        compiler_params=pltpu.CompilerParams(
            dimension_semantics=("parallel",)),
        cost_estimate=pl.CostEstimate(
            flops=int(flops), transcendentals=0,
            bytes_accessed=int(bytes_accessed)),
    )(basis, coef)
    return out[:, :t, :d]


def fourier_layer_forward_reference(x, low_freq=1, factor=1):
    """Pure-JAX reference reproducing the PyTorch module (amp*cos(2*pi*f*t+phase))."""
    b, t, d = x.shape
    x_freq = jnp.fft.rfft(x, axis=1)
    if t % 2 == 0:
        x_freq = x_freq[:, low_freq:-1]
        f = jnp.fft.rfftfreq(t)[low_freq:-1]
    else:
        x_freq = x_freq[:, low_freq:]
        f = jnp.fft.rfftfreq(t)[low_freq:]
    length = x_freq.shape[1]
    top_k = max(1, int(factor * math.log(length)))
    top_k = min(top_k, length)

    mag_t = jnp.transpose(jnp.abs(x_freq), (0, 2, 1))           # (b, d, F)
    _, idx = jax.lax.top_k(mag_t, top_k)                        # (b, d, k)
    xf_t = jnp.transpose(x_freq, (0, 2, 1))                     # (b, d, F)
    xf_sel = jnp.take_along_axis(xf_t, idx, axis=-1)            # (b, d, k)
    x_freq_k = jnp.transpose(xf_sel, (0, 2, 1))                 # (b, k, d)
    f_k = jnp.transpose(f.astype(jnp.float32)[idx], (0, 2, 1))  # (b, k, d)

    amp = jnp.abs(x_freq_k).astype(jnp.float32)
    phase = jnp.angle(x_freq_k).astype(jnp.float32)
    amp2 = jnp.concatenate([amp, amp], axis=1)                  # (b, 2k, d)
    freq2 = jnp.concatenate([f_k, -f_k], axis=1)
    phase2 = jnp.concatenate([phase, -phase], axis=1)

    tt = jnp.arange(t, dtype=jnp.float32)[None, None, :, None]  # (1,1,t,1)
    x_time = amp2[:, :, None, :] * jnp.cos(
        2.0 * math.pi * freq2[:, :, None, :] * tt + phase2[:, :, None, :])
    return jnp.sum(x_time, axis=1)                              # (b, t, d)


if __name__ == "__main__":
    # FourierLayer has no learnable parameters (d_model/low_freq/factor are config).
    key = jax.random.PRNGKey(0)
    b, t, d = 2, 64, 16      # t even -> exercises the [low_freq:-1] slicing branch
    x = jax.random.normal(key, (b, t, d), dtype=jnp.float32)

    out = fourier_layer_forward(x, low_freq=1, factor=1)
    out = jax.block_until_ready(out)

    ref = jax.block_until_ready(fourier_layer_forward_reference(x, low_freq=1, factor=1))
    scale = float(jnp.max(jnp.abs(ref))) + 1e-6
    np.testing.assert_allclose(np.asarray(out), np.asarray(ref),
                               rtol=1e-3, atol=1e-3 * scale)
    print("KERNEL_OK")
</pallas_src>

<mosaic_0001>
module attributes {stable_mosaic.version = 11 : i64} {
  func.func @_idft_matmul_kernel(%arg0: i32, %arg1: memref<64x128xf32, #tpu.memory_space<vmem>>, %arg2: memref<1x128x128xf32, #tpu.memory_space<vmem>>, %arg3: memref<1x64x128xf32, #tpu.memory_space<vmem>>) attributes {dimension_semantics = [#tpu.dimension_semantics<parallel>], iteration_bounds = array<i64: 2>, scalar_prefetch = 0 : i64, scratch_operands = 0 : i64, tpu.core_type = #tpu.core_type<tc>, window_params = [{pipeline_mode = #tpu.pipeline_mode<synchronous>, transform_indices = @transform_0, window_bounds = array<i64: 64, 128>}, {transform_indices = @transform_1, window_bounds = array<i64: 1, 128, 128>}, {transform_indices = @transform_2, window_bounds = array<i64: 1, 64, 128>}]} {
    %c0 = arith.constant 0 : index
    %c0_0 = arith.constant 0 : index
    %0 = vector.load %arg1[%c0, %c0_0] : memref<64x128xf32, #tpu.memory_space<vmem>>, vector<64x128xf32>
    %c0_1 = arith.constant 0 : index
    %c0_2 = arith.constant 0 : index
    %c0_3 = arith.constant 0 : index
    %1 = vector.load %arg2[%c0_1, %c0_2, %c0_3] : memref<1x128x128xf32, #tpu.memory_space<vmem>>, vector<1x128x128xf32>
    %2 = vector.shape_cast %1 : vector<1x128x128xf32> to vector<128x128xf32>
    %cst = arith.constant dense<0.000000e+00> : vector<64x128xf32>
    %3 = tpu.matmul %0, %2, %cst {dimension_numbers = #tpu.dot_dimension_numbers<[1], [0], [0], [1], [0, 0, 1, 1], [], []>} : vector<64x128xf32>, vector<128x128xf32>, vector<64x128xf32> -> vector<64x128xf32>
    %c0_4 = arith.constant 0 : index
    %c0_5 = arith.constant 0 : index
    %c0_6 = arith.constant 0 : index
    %4 = vector.load %arg3[%c0_4, %c0_5, %c0_6] : memref<1x64x128xf32, #tpu.memory_space<vmem>>, vector<1x64x128xf32>
    %5 = vector.shape_cast %4 : vector<1x64x128xf32> to vector<64x128xf32>
    %6 = vector.shape_cast %3 : vector<64x128xf32> to vector<1x64x128xf32>
    tpu.vector_store %arg3[%c0_4, %c0_5, %c0_6], %6 {strides = array<i32>} : memref<1x64x128xf32, #tpu.memory_space<vmem>>, vector<1x64x128xf32>,
    return
  }
  func.func @transform_0(%arg0: i32) -> (i32, i32) {
    %c0_i32 = arith.constant 0 : i32
    %c0_i32_0 = arith.constant 0 : i32
    %c0_i32_1 = arith.constant 0 : i32
    return %c0_i32, %c0_i32_0 : i32, i32
  }
  func.func @transform_1(%arg0: i32) -> (i32, i32, i32) {
    %c0_i32 = arith.constant 0 : i32
    %c0_i32_0 = arith.constant 0 : i32
    %c0_i32_1 = arith.constant 0 : i32
    return %arg0, %c0_i32, %c0_i32_0 : i32, i32, i32
  }
  func.func @transform_2(%arg0: i32) -> (i32, i32, i32) {
    %c0_i32 = arith.constant 0 : i32
    %c0_i32_0 = arith.constant 0 : i32
    %c0_i32_1 = arith.constant 0 : i32
    return %arg0, %c0_i32, %c0_i32_0 : i32, i32, i32
  }
}

</mosaic_0001>

<bundles_post_ra>
// kernel: tpu_custom_call.1
= control target key start
LH: loop header
LB: loop body
LE: loop exit
PB: predicated region body
PF: predicated region fallthrough
CT: control target
= control target key end

     0   :  { %7 = vsyncpa [#allocation3], 0  ;;  %s797_s0 = inlined_call_operand.hbm [shape: f32[64,128], index: 0, kind: input, shape index: {}]   ;;  %s798_s1 = inlined_call_operand.hbm [shape: f32[2,128,128], index: 1, kind: input, shape index: {}]   ;;  %s799_s2 = inlined_call_operand.hbm [shape: f32[2,64,128], index: 2, kind: output, shape index: {}]  }
   0x1   :  { %8 = vsyncpa [#allocation6], 0 }
   0x2   :  { %10 = vsyncpa [#allocation6 + $0x1], 0 }
   0x3   :  { %11 = vsyncpa [#allocation4], 0 }
   0x4   :  { %13 = vsyncpa [#allocation4 + $0x1], 0  ;;  %s634_s9 = smov 0   ;;  %s636_s10 = smov 0  }
   0x5   :  { %s638_s11 = smov 0   ;;  %s640_s12 = smov 0  }
   0x6 LB: > { %s655_s13 = sadd.s32 4294967295, %s612_s12   ;;  %s355_s14 = sadd.s32 4294967294, %s612_s12   ;;  %s612_s12 = sphi %s640_s12, %s809_s12   ;;  %s608_s11 = sphi %s638_s11, %s808_s11   ;;  %s604_s10 = sphi %s636_s10, %s807_s10   ;;  %s600_s9 = sphi %s634_s9, %s806_s9  }
   0x7   : > { %p60_p0 = scmp.ne.s32.totalorder %s604_s10, %s600_s9  ;;  %p61_p1 = scmp.eq.s32.totalorder %s655_s13, 0 }
   0x8   : > { %p84_p2 = scmp.eq.s32.totalorder %s655_s13, 1  ;;  %p90_p3 = scmp.eq.s32.totalorder %s355_s14, 1 }
   0x9   : > { %p664_p4 = por %p61_p1, %p60_p0  ;;  %p356_p5 = scmp.ge.s32.totalorder %s612_s12, 1 }
   0xa   : > { %p669_p6 = por %p90_p3, %p60_p0  ;;  %p97_p7 = scmp.lt.s32.totalorder %s612_s12, 3 }
   0xb   : > { %s108_s19 = sshll.u32 %s797_s0, 4  ;;  %s614_s21 = smov [#allocation2]   ;;  %s109_s19 = int_to_ptr.hbm [resolvable:$true] %s108_s19 }
   0xc   : > { %p677_p8 = pnand %p356_p5, %p97_p7  ;;  %s110_s22 = sshll.u32 %s614_s21, 4  ;;  %s111_s22 = int_to_ptr.vmem [resolvable:$true] %s110_s22 }
   0xd   : > { %s687_s23 = sadd.s32 1, %s612_s12   ;;  %s615_s24 = smov 128  }
   0xe   : > { %p429_p9 = pneg %p677_p8  ;;  %s616_s25 = smov 8  }
   0xf   : > { %s44_s26 = ssub.s32 %s612_s12, %s687_s23  ;;  %s47_s27 = sadd.s32 1, %s608_s11 }
  0x10   : > { %p430_p10 = pnand %p429_p9, %p61_p1  ;;  %p45_p12 = scmp.eq.s32.totalorder %s44_s26, 0 }
  0x11   : > { %p54_p13 = scmp.ne.s32.totalorder %s608_s11, %s604_s10  ;;  %p55_p0 = scmp.eq.s32.totalorder %s612_s12, 0 }
  0x12   : > { %432 = dma.hbm_to_vmem [thread:$0]  (!%p430_p10), %s109_s19, 1024, %s111_s22, [#allocation3], %s615_s24, %s615_s24, %s616_s25  }
  0x13   : > { %s699_s28 = scalar_select %p45_p12, %s608_s11, %s47_s27  }
  0x14   : > { %p703_p3 = por %p84_p2, %p54_p13  ;;  %p442_p5 = scmp.lt.s32.totalorder %s612_s12, 2 }
  0x15   : > { %s124_s30 = sand.u32 1, %s608_s11   ;;  %s371_s3 = sshll.u32 %s612_s12, 7 }
  0x16   : > { %p56_p7 = por %p55_p0, %p54_p13  ;;  %s359_s4 = sshll.u32 %s124_s30, 7 }
  0x17   : > { %s133_s7 = scalar_lea.hbm %s798_s1, %s371_s3  ;;  %s128_s14 = scalar_lea.vmem [#allocation5], %s359_s4 }
  0x18   : > { %s134_s8 = sshll.u32 %s133_s7, 4  ;;  %s136_s17 = sshll.u32 %s128_s14, 4  ;;  %s135_s8 = int_to_ptr.hbm [resolvable:$true] %s134_s8  ;;  %s137_s17 = int_to_ptr.vmem [resolvable:$true] %s136_s17 }
  0x19   : > { %p713_p9 = pnand %p442_p5, %p56_p7  ;;  %s125_s19 = scalar_lea.sflag [#allocation6], %s124_s30 }
  0x1a   : > { %s512_s21 = sshra.s32 %s135_s8, 4  ;;  %s519_s3 = scalar_lea.hbm %s798_s1, 256  ;;  %s513_s21 = int_to_ptr.hbm [resolvable:$true] %s512_s21 }
  0x1b   : > { %s514_s22 = scalar_lea.hbm %s513_s21, 128  ;;  %p516_p10 = pneg %p713_p9 }
  0x1c   : > { %p515_p2 = scmp.ne.s32.totalorder %s513_s21, %s514_s22  ;;  %p520_p0 = scmp.lt.s32.totalorder %s513_s21, %s798_s1 }
  0x1d   : > { %p521_p5 = scmp.lt.s32.totalorder %s519_s3, %s514_s22 }
  0x1e   : > { %p517_p12 = pnand %p516_p10, %p515_p2 }
  0x1f   : > { %p522_p7 = por %p521_p5, %p520_p0 }
  0x20   : > { %p518_p13 = pneg %p517_p12 }
  0x22   : > { %p523_p11 = pnand %p522_p7, %p518_p13 }
  0x24   : > { %526 = shalt.err (!%p523_p11)
}
  0x25   : > { %436 = dma.hbm_to_vmem [thread:$0]  (!%p713_p9), %s135_s8, 2048, %s137_s17, %s125_s19, %s615_s24, %s615_s24, %s616_s25  }
  0x26   : > { %148 = sbr.rel (%p677_p8) target bundleno = 225 (0xe1), region = 28 }
  0x2b   : > { %587 = dma.done.wait (%p61_p1), [#allocation3], 1024  }
  0x2c   : > { %589 = vsyncadd (%p61_p1), [#allocation3], 4294966272  ;;  %s737_s30 = sand.u32 1, %s604_s10  }
  0x2d   : > { %s364_s6 = sshll.u32 %s737_s30, 7  ;;  %s156_s7 = scalar_lea.sflag [#allocation6], %s737_s30 }
  0x2e   : > { %s741_s14 = scalar_lea.vmem [#allocation5], %s364_s6 }
  0x2f   : > { %591 = dma.done.wait (%p664_p4), %s156_s7, 2048  }
  0x30   : > { %593 = vsyncadd (%p664_p4), %s156_s7, 4294965248  ;;  %v204_v0 = vld [vmem:[%s741_s14 + $0x78] sm:$0xff]  ;;  %v203_v1 = vld [vmem:[%s741_s14 + $0x70] sm:$0xff]  ;;  %s365_s15 = sshll.u32 %s737_s30, 6  ;;  %s372_s24 = sshll.u32 %s655_s13, 6 }
  0x31   : > { %374 = vmatpush.msra.mxu2 %v204_v0  ;;  %375 = vmatpush.msra.mxu3 %v204_v0  ;;  %v202_v2 = vld [vmem:[%s741_s14 + $0x68] sm:$0xff]  ;;  %v201_v3 = vld [vmem:[%s741_s14 + $0x60] sm:$0xff]  ;;  %v200_v4 = vld [vmem:[%s741_s14 + $0x58] sm:$0xff]  ;;  %s180_s20 = scalar_lea.vmem [#allocation7], %s365_s15  ;;  %s266_s17 = scalar_lea.hbm %s799_s2, %s372_s24 }
  0x32   : > { %205 = vmatpush.msra.mxu0 %v204_v0  ;;  %373 = vmatpush.msra.mxu1 %v204_v0  ;;  %v199_v5 = vld [vmem:[%s741_s14 + $0x50] sm:$0xff]  ;;  %v198_v6 = vld [vmem:[%s741_s14 + $0x48] sm:$0xff]  ;;  %v197_v7 = vld [vmem:[%s741_s14 + $0x40] sm:$0xff]  ;;  %s267_s18 = sshll.u32 %s180_s20, 4  ;;  %s269_s19 = sshll.u32 %s266_s17, 4  ;;  %s268_s18 = int_to_ptr.vmem [resolvable:$true] %s267_s18  ;;  %s270_s19 = int_to_ptr.hbm [resolvable:$true] %s269_s19 }
  0x33   : > { %377 = vmatpush.msra.mxu2 %v203_v1  ;;  %378 = vmatpush.msra.mxu3 %v203_v1  ;;  %v196_v8 = vld [vmem:[%s741_s14 + $0x38] sm:$0xff]  ;;  %v195_v9 = vld [vmem:[%s741_s14 + $0x30] sm:$0xff]  ;;  %v194_v10 = vld [vmem:[%s741_s14 + $0x28] sm:$0xff]  ;;  %s255_s13 = scalar_lea.sflag [#allocation4], %s737_s30  ;;  %s556_s21 = sshra.s32 %s270_s19, 4  ;;  %s557_s21 = int_to_ptr.hbm [resolvable:$true] %s556_s21 }
  0x34   : > { %206 = vmatpush.msra.mxu0 %v203_v1  ;;  %376 = vmatpush.msra.mxu1 %v203_v1  ;;  %v193_v11 = vld [vmem:[%s741_s14 + $0x20] sm:$0xff]  ;;  %v192_v12 = vld [vmem:[%s741_s14 + $0x18] sm:$0xff]  ;;  %v191_v13 = vld [vmem:[%s741_s14 + $0x10] sm:$0xff]  ;;  %s558_s22 = scalar_lea.hbm %s557_s21, 64  ;;  %s562_s3 = scalar_lea.hbm %s799_s2, 128 }
  0x35   : > { %380 = vmatpush.msra.mxu2 %v202_v2  ;;  %381 = vmatpush.msra.mxu3 %v202_v2  ;;  %v190_v14 = vld [vmem:[%s741_s14 + $0x8] sm:$0xff]  ;;  %v189_v15 = vld [vmem:[%s741_s14] sm:$0xff]  ;;  %v187_v17 = vld [vmem:[#allocation2 + $0x30] sm:$0xff]  ;;  %p559_p1 = scmp.ne.s32.totalorder %s557_s21, %s558_s22  ;;  %p563_p11 = scmp.lt.s32.totalorder %s557_s21, %s799_s2 }
  0x36   : > { %207 = vmatpush.msra.mxu0 %v202_v2  ;;  %379 = vmatpush.msra.mxu1 %v202_v2  ;;  %v185_v16 = vld [vmem:[#allocation2 + $0x20] sm:$0xff]  ;;  %v183_v19 = vld [vmem:[#allocation2 + $0x10] sm:$0xff]  ;;  %v186_v20 = vld [vmem:[#allocation2 + $0x28] sm:$0xff]  ;;  %p564_p9 = scmp.lt.s32.totalorder %s562_s3, %s558_s22 }
  0x37   : > { %383 = vmatpush.msra.mxu2 %v201_v3  ;;  %384 = vmatpush.msra.mxu3 %v201_v3  ;;  %v181_v18 = vld [vmem:[#allocation2] sm:$0xff]  ;;  %v188_v21 = vld [vmem:[#allocation2 + $0x38] sm:$0xff]  ;;  %v182_v22 = vld [vmem:[#allocation2 + $0x8] sm:$0xff]  ;;  %p560_p4 = pnand %p559_p1, %p703_p3 }
  0x38   : > { %208 = vmatpush.msra.mxu0 %v201_v3  ;;  %382 = vmatpush.msra.mxu1 %v201_v3  ;;  %v184_v23 = vld [vmem:[#allocation2 + $0x18] sm:$0xff]  ;;  %p565_p2 = por %p564_p9, %p563_p11 }
  0x39   : > { %386 = vmatpush.msra.mxu2 %v200_v4  ;;  %387 = vmatpush.msra.mxu3 %v200_v4  ;;  %p561_p8 = pneg %p560_p4 }
  0x3a   : > { %209 = vmatpush.msra.mxu0 %v200_v4  ;;  %385 = vmatpush.msra.mxu1 %v200_v4 }
  0x3b   : > { %389 = vmatpush.msra.mxu2 %v199_v5  ;;  %390 = vmatpush.msra.mxu3 %v199_v5  ;;  %p566_p10 = pnand %p565_p2, %p561_p8 }
  0x3c   : > { %210 = vmatpush.msra.mxu0 %v199_v5  ;;  %388 = vmatpush.msra.mxu1 %v199_v5 }
  0x3d   : > { %392 = vmatpush.msra.mxu2 %v198_v6  ;;  %393 = vmatpush.msra.mxu3 %v198_v6 }
  0x3e   : > { %211 = vmatpush.msra.mxu0 %v198_v6  ;;  %391 = vmatpush.msra.mxu1 %v198_v6 }
  0x3f   : > { %395 = vmatpush.msra.mxu2 %v197_v7  ;;  %396 = vmatpush.msra.mxu3 %v197_v7 }
  0x40   : > { %212 = vmatpush.msra.mxu0 %v197_v7  ;;  %394 = vmatpush.msra.mxu1 %v197_v7 }
  0x41   : > { %398 = vmatpush.msra.mxu2 %v196_v8  ;;  %399 = vmatpush.msra.mxu3 %v196_v8 }
  0x42   : > { %213 = vmatpush.msra.mxu0 %v196_v8  ;;  %397 = vmatpush.msra.mxu1 %v196_v8 }
  0x43   : > { %401 = vmatpush.msra.mxu2 %v195_v9  ;;  %402 = vmatpush.msra.mxu3 %v195_v9 }
  0x44   : > { %214 = vmatpush.msra.mxu0 %v195_v9  ;;  %400 = vmatpush.msra.mxu1 %v195_v9 }
  0x45   : > { %404 = vmatpush.msra.mxu2 %v194_v10  ;;  %405 = vmatpush.msra.mxu3 %v194_v10 }
  0x46   : > { %215 = vmatpush.msra.mxu0 %v194_v10  ;;  %403 = vmatpush.msra.mxu1 %v194_v10 }
  0x47   : > { %407 = vmatpush.msra.mxu2 %v193_v11  ;;  %408 = vmatpush.msra.mxu3 %v193_v11 }
  0x48   : > { %216 = vmatpush.msra.mxu0 %v193_v11  ;;  %406 = vmatpush.msra.mxu1 %v193_v11 }
  0x49   : > { %410 = vmatpush.msra.mxu2 %v192_v12  ;;  %411 = vmatpush.msra.mxu3 %v192_v12 }
  0x4a   : > { %217 = vmatpush.msra.mxu0 %v192_v12  ;;  %409 = vmatpush.msra.mxu1 %v192_v12 }
  0x4b   : > { %413 = vmatpush.msra.mxu2 %v191_v13  ;;  %414 = vmatpush.msra.mxu3 %v191_v13 }
  0x4c   : > { %218 = vmatpush.msra.mxu0 %v191_v13  ;;  %412 = vmatpush.msra.mxu1 %v191_v13 }
  0x4d   : > { %416 = vmatpush.msra.mxu2 %v190_v14  ;;  %417 = vmatpush.msra.mxu3 %v190_v14 }
  0x4e   : > { %219 = vmatpush.msra.mxu0 %v190_v14  ;;  %415 = vmatpush.msra.mxu1 %v190_v14 }
  0x4f   : > { %419 = vmatpush.msra.mxu2 %v189_v15  ;;  %420 = vmatpush.msra.mxu3 %v189_v15 }
  0x50   : > { %233 = vmatmul.f32.vlgmr.msra.gmra.mxu2 %v185_v16  ;;  %239 = vmatmul.f32.vlgmr.msra.gmra.mxu3 %v187_v17 }
  0x51   : > { %220 = vmatpush.msra.mxu0 %v189_v15  ;;  %418 = vmatpush.msra.mxu1 %v189_v15 }
  0x52   : > { %221 = vmatmul.f32.vlgmr.msra.gmra.mxu0 %v181_v18  ;;  %227 = vmatmul.f32.vlgmr.msra.gmra.mxu1 %v183_v19 }
  0x58   : > { %236 = vmatmul.f32.gmra.mxu2 %v186_v20  ;;  %242 = vmatmul.f32.gmra.mxu3 %v188_v21 }
  0x5a   : > { %224 = vmatmul.f32.gmra.mxu0 %v182_v22  ;;  %230 = vmatmul.f32.gmra.mxu1 %v184_v23 }
  0xcf   : > { %v222_v24 = vpop.f32.mrf.mxu0  ;;  %v228_v25 = vpop.f32.mrf.mxu1 }
  0xd0   : > { %246 = vst [vmem:[%s180_s20] sm:$0xff] %v222_v24 }
  0xd1   : > { %248 = vst [vmem:[%s180_s20 + $0x10] sm:$0xff] %v228_v25 }
  0xd3   : > { %v234_v26 = vpop.f32.mrf.mxu2  ;;  %v240_v27 = vpop.f32.mrf.mxu3 }
  0xd4   : > { %250 = vst [vmem:[%s180_s20 + $0x20] sm:$0xff] %v234_v26 }
  0xd5   : > { %252 = vst [vmem:[%s180_s20 + $0x30] sm:$0xff] %v240_v27 }
  0xd7   : > { %v225_v28 = vpop.f32.mrf.mxu0  ;;  %v231_v29 = vpop.f32.mrf.mxu1 }
  0xd8   : > { %247 = vst [vmem:[%s180_s20 + $0x8] sm:$0xff] %v225_v28 }
  0xd9   : > { %249 = vst [vmem:[%s180_s20 + $0x18] sm:$0xff] %v231_v29 }
  0xdb   : > { %v237_v30 = vpop.f32.mrf.mxu2  ;;  %v243_v31 = vpop.f32.mrf.mxu3 }
  0xdc   : > { %251 = vst [vmem:[%s180_s20 + $0x28] sm:$0xff] %v237_v30 }
  0xdd   : > { %253 = vst [vmem:[%s180_s20 + $0x38] sm:$0xff] %v243_v31 }
  0xde   : > { %569 = shalt.err (!%p566_p10)
}
  0xdf   : > { %s617_s30 = smov 128   ;;  %s618_s6 = smov 8  }
  0xe0   : > { %427 = dma.vmem_to_hbm [thread:$0]  (%p703_p3), %s268_s18, 1024, %s270_s19, %s255_s13, %s617_s30, %s617_s30, %s618_s6  }
  0xe1 PF: > { %s284_s7 = sand.u32 1, %s600_s9   ;;  %p805_p12 = scmp.ge.s32.totalorder %s612_s12, 2 }
  0xe2   : > { %s285_s14 = scalar_lea.sflag [#allocation4], %s284_s7 }
  0xe3   : > { %p438_p13 = pnand %p805_p12, %p669_p6 }
  0xe5   : > { %p439_p0 = pneg %p438_p13 }
  0xe7   : > { %595 = dma.done.wait (%p439_p0), %s285_s14, 1024  }
  0xe8   : > { %597 = vsyncadd (%p439_p0), %s285_s14, 4294966272  ;;  %p16_p5 = scmp.ge.s32.totalorder %s687_s23, 4   ;;  %s806_s9 = smov %s604_s10 }
  0xe9   : > { %s807_s10 = smov %s608_s11  ;;  %s808_s11 = smov %s699_s28 }
  0xea   : > { %s809_s12 = smov %s687_s23  ;;  %18 = sbr.rel (!%p16_p5) target bundleno = 6 (0x6), region = 78 }
  0xef   :  { %291 = vsyncpa [#allocation3], 1 }
  0xf0   :  { %293 = vsyncpa [#allocation3 + $0x1], 1 }
  0xf1   :  { %294 = vsyncpa [#allocation6], 1 }
  0xf2   :  { %296 = vsyncpa [#allocation6 + $0x1], 1 }
  0xf3   :  { %297 = vsyncpa [#allocation4], 1 }
  0xf4   :  { %299 = vsyncpa [#allocation4 + $0x1], 1 }

</bundles_post_ra>
